<compile_context>
chip_gen: v5e
topology: v5e:2x2
jax: 0.10.0
libtpu: 0.0.40
codegen_flags: <defaults>
</compile_context>

<pallas_src>
import functools

import jax
import jax.numpy as jnp
from jax import lax
from jax.experimental import pallas as pl
from jax.experimental.pallas import tpu as pltpu


# ----------------------------- tiling helpers ------------------------------ #

def _round_up(x, m):
    return ((x + m - 1) // m) * m


def _tile_m(ab):
    """Output-tile edge: 128 for tiny channel counts, else 256 (matches the
    256x256 MXU on v6e/v7x; decomposes fine on v5e)."""
    return 128 if ab <= 128 else 256


def _vmem_budget_bytes():
    """~75% of physical VMEM: 48 MiB on 64 MiB v7x, 96 MiB on 128 MiB v5e/v6e."""
    cap = 64 << 20                       # conservative fallback (v7x-sized)
    try:
        info = pltpu.get_tpu_info()
        cap = int(getattr(info, "vmem_capacity_bytes", cap))
    except Exception:
        pass
    return max(cap * 3 // 4, 16 << 20)


def _k_tiling(cd, tm, itemsize, budget):
    """K-tile size: multiple of 128, >= 512 when possible, sized so the
    double-buffered (tm, tk) feature operands plus the resident (tm, tm) f32
    blocks fit inside the VMEM budget. Returns (tk, n_k, cd_pad)."""
    cd128 = _round_up(cd, 128)
    avail = budget - 3 * tm * tm * 4 - (2 << 20)          # resident blocks + headroom
    tk = (avail // max(4 * tm * itemsize, 1)) // 128 * 128  # 2 operands x 2 buffers
    tk = max(512, tk)
    tk = min(tk, cd128)
    n_k = -(-cd128 // tk)
    tk = _round_up(-(-cd128 // n_k), 128)  # spread padding evenly across K tiles
    return tk, n_k, n_k * tk


def _prep_features(x, compute_dtype):
    """(a, b, c, d) -> zero-padded (ab_pad, cd_pad) feature matrix + config.
    Zero rows/cols contribute nothing to F @ F^T."""
    a, b, c, d = x.shape
    ab, cd = a * b, c * d
    feats = x.reshape(ab, cd)
    if compute_dtype is not None and feats.dtype != jnp.dtype(compute_dtype):
        feats = feats.astype(compute_dtype)   # bf16 stream: faster MXU, half the DMA
    tm = _tile_m(ab)
    ab_pad = _round_up(ab, tm)
    budget = _vmem_budget_bytes()
    tk, n_k, cd_pad = _k_tiling(cd, tm, feats.dtype.itemsize, budget)
    if ab_pad != ab or cd_pad != cd:
        feats = jnp.pad(feats, ((0, ab_pad - ab), (0, cd_pad - cd)))
    cfg = dict(ab=ab, ab_pad=ab_pad, tm=tm, tk=tk, n_k=n_k, cd_pad=cd_pad,
               scale=1.0 / float(a * b * c * d), budget=budget)
    return feats, cfg


# ----------------------------- kernels ------------------------------------- #

def _gram_kernel(frow_ref, fcol_ref, g_ref, *, scale):
    # frow_ref/fcol_ref: (tm, tk) K-tiles of the feature rows/cols of this
    # output tile; g_ref: (tm, tm) f32 output tile, resident across K.
    k = pl.program_id(2)

    @pl.when(k == 0)
    def _init():
        g_ref[...] = jnp.zeros_like(g_ref)

    g_ref[...] += lax.dot_general(
        frow_ref[...], fcol_ref[...],
        dimension_numbers=(((1,), (1,)), ((), ())),
        preferred_element_type=jnp.float32)

    @pl.when(k == pl.num_programs(2) - 1)
    def _finalize():
        g_ref[...] = g_ref[...] * scale


def _style_loss_kernel(i_ref, j_ref, frow_ref, fcol_ref, tgt_ref,
                       part_ref, acc_ref, *, scale):
    # One upper-triangular (i <= j) output tile per pair p; gram never leaves
    # VMEM.  part_ref: (8, 128) lane-dense partial-MSE block for this pair.
    p = pl.program_id(0)
    k = pl.program_id(1)

    @pl.when(k == 0)
    def _init():
        acc_ref[...] = jnp.zeros_like(acc_ref)

    acc_ref[...] += lax.dot_general(
        frow_ref[...], fcol_ref[...],
        dimension_numbers=(((1,), (1,)), ((), ())),
        preferred_element_type=jnp.float32)

    @pl.when(k == pl.num_programs(1) - 1)
    def _finalize():
        # Off-diagonal tiles stand in for their transposed twin as well.
        w = jnp.where(i_ref[p] == j_ref[p], 1.0, 2.0).astype(jnp.float32)
        diff = acc_ref[...] * scale - tgt_ref[...]
        partial = w * jnp.sum(diff * diff)
        part_ref[...] = jnp.full(part_ref.shape, partial, jnp.float32)


# ----------------------------- wrappers ------------------------------------ #

def gram_matrix(x, *, compute_dtype=jnp.bfloat16):
    """Pallas gram matrix: (a, b, c, d) -> (a*b, a*b) float32."""
    feats, cfg = _prep_features(x, compute_dtype)
    tm, tk, n_k = cfg["tm"], cfg["tk"], cfg["n_k"]
    ab_pad = cfg["ab_pad"]
    t = ab_pad // tm
    item = feats.dtype.itemsize
    cost = pl.CostEstimate(
        flops=int(2 * ab_pad * ab_pad * cfg["cd_pad"]),
        transcendentals=0,
        bytes_accessed=int(2 * t * ab_pad * cfg["cd_pad"] * item
                           + ab_pad * ab_pad * 4))

    g = pl.pallas_call(
        functools.partial(_gram_kernel, scale=cfg["scale"]),
        out_shape=jax.ShapeDtypeStruct((ab_pad, ab_pad), jnp.float32),
        grid_spec=pltpu.PrefetchScalarGridSpec(
            num_scalar_prefetch=0,
            grid=(t, t, n_k),
            in_specs=[pl.BlockSpec((tm, tk), lambda i, j, k: (i, k)),
                      pl.BlockSpec((tm, tk), lambda i, j, k: (j, k))],
            out_specs=pl.BlockSpec((tm, tm), lambda i, j, k: (i, j)),
        ),
        compiler_params=pltpu.CompilerParams(
            dimension_semantics=("parallel", "parallel", "arbitrary"),
            vmem_limit_bytes=int(cfg["budget"])),
        cost_estimate=cost,
    )(feats, feats)
    return g[:cfg["ab"], :cfg["ab"]]


def style_loss_forward(x, target_gram, *, compute_dtype=jnp.bfloat16):
    """Returns (x unchanged, scalar MSE(gram(x), target_gram))."""
    feats, cfg = _prep_features(x, compute_dtype)
    ab, ab_pad, tm, tk, n_k = cfg["ab"], cfg["ab_pad"], cfg["tm"], cfg["tk"], cfg["n_k"]
    t = ab_pad // tm

    # Upper-triangular tile pairs (gram symmetry): diagonal weight 1, off 2.
    pairs = [(i, j) for i in range(t) for j in range(i, t)]
    n_pairs = len(pairs)
    i_map = jnp.asarray([p[0] for p in pairs], dtype=jnp.int32)
    j_map = jnp.asarray([p[1] for p in pairs], dtype=jnp.int32)

    # Zero-pad the target so padded gram rows/cols (also zero) contribute 0.
    tgt = target_gram.astype(jnp.float32)
    if ab_pad != ab:
        tgt = jnp.pad(tgt, ((0, ab_pad - ab), (0, ab_pad - ab)))

    item = feats.dtype.itemsize
    cost = pl.CostEstimate(
        flops=int(2 * n_pairs * tm * tm * cfg["cd_pad"]),
        transcendentals=0,
        bytes_accessed=int(n_pairs * (2 * tm * cfg["cd_pad"] * item + tm * tm * 4)))

    partials = pl.pallas_call(
        functools.partial(_style_loss_kernel, scale=cfg["scale"]),
        out_shape=jax.ShapeDtypeStruct((n_pairs * 8, 128), jnp.float32),
        grid_spec=pltpu.PrefetchScalarGridSpec(
            num_scalar_prefetch=2,
            grid=(n_pairs, n_k),
            in_specs=[
                pl.BlockSpec((tm, tk), lambda p, k, im, jm: (im[p], k)),   # rows
                pl.BlockSpec((tm, tk), lambda p, k, im, jm: (jm[p], k)),   # cols
                pl.BlockSpec((tm, tm), lambda p, k, im, jm: (im[p], jm[p])),  # target
            ],
            out_specs=pl.BlockSpec((8, 128), lambda p, k, im, jm: (p, 0)),
            scratch_shapes=[pltpu.VMEM((tm, tm), jnp.float32)],
        ),
        compiler_params=pltpu.CompilerParams(
            dimension_semantics=("parallel", "arbitrary"),
            vmem_limit_bytes=int(cfg["budget"])),
        cost_estimate=cost,
    )(i_map, j_map, feats, feats, tgt)

    loss = jnp.sum(partials.reshape(n_pairs, 8, 128)[:, 0, 0]) / float(ab * ab)
    return x, loss


class StyleLoss:
    """JAX/Pallas equivalent of the PyTorch StyleLoss module."""

    def __init__(self, target_feature, *, compute_dtype=jnp.bfloat16):
        # compute_dtype=None -> f32 MXU operands (exact PyTorch parity).
        self.compute_dtype = compute_dtype
        self.target = lax.stop_gradient(
            gram_matrix(target_feature, compute_dtype=compute_dtype))
        self.loss = None

    def __call__(self, x):
        out, self.loss = style_loss_forward(
            x, self.target, compute_dtype=self.compute_dtype)
        return out


# ------------------------------- demo --------------------------------------- #

def _ref_gram(t):
    a, b, c, d = t.shape
    f = t.reshape(a * b, c * d)
    g = lax.dot_general(f, f, dimension_numbers=(((1,), (1,)), ((), ())),
                        preferred_element_type=jnp.float32)
    return g / (a * b * c * d)


def _ref_loss(x, style):
    return jnp.mean((_ref_gram(x) - _ref_gram(style)) ** 2)


if __name__ == "__main__":
    key = jax.random.PRNGKey(0)
    k1, k2, k3, k4 = jax.random.split(key, 4)

    # Small conv-feature shape: batch=2, channels=4, spatial 16x16.
    shape = (2, 4, 16, 16)
    style = jax.random.normal(k1, shape, dtype=jnp.float32)
    x = jax.random.normal(k2, shape, dtype=jnp.float32)
    ref_loss = _ref_loss(x, style)

    # Exact path (f32 MXU operands): tight check against the f32 reference.
    mod = StyleLoss(style, compute_dtype=None)
    out = jax.block_until_ready(mod(x))
    loss = jax.block_until_ready(mod.loss)
    assert out.shape == x.shape and bool(jnp.allclose(out, x))
    assert mod.target.shape == (8, 8)
    assert bool(jnp.allclose(mod.target, _ref_gram(style), rtol=1e-3, atol=1e-5))
    assert bool(jnp.allclose(loss, ref_loss, rtol=1e-3, atol=1e-6))

    # Default fast path (bf16 MXU operands, f32 accumulation).
    mod_fast = StyleLoss(style)
    out2 = jax.block_until_ready(mod_fast(x))
    loss_fast = jax.block_until_ready(mod_fast.loss)
    assert out2.shape == x.shape and bool(jnp.allclose(out2, x))
    assert bool(jnp.allclose(loss_fast, ref_loss, rtol=5e-2, atol=1e-5))

    # Larger channel count: exercises multi-tile output, symmetry weighting
    # and AB padding/masking (AB=320 -> 2x2 tiles of 256, 3 triangular pairs).
    shape2 = (1, 320, 8, 8)
    style2 = jax.random.normal(k3, shape2, dtype=jnp.float32)
    x2 = jax.random.normal(k4, shape2, dtype=jnp.float32)
    mod2 = StyleLoss(style2)
    _ = jax.block_until_ready(mod2(x2))
    loss2 = jax.block_until_ready(mod2.loss)
    assert bool(jnp.allclose(loss2, _ref_loss(x2, style2), rtol=5e-2, atol=1e-7))

    print("KERNEL_OK")
</pallas_src>

<mosaic_0001>
module attributes {stable_mosaic.version = 11 : i64} {
  func.func @_gram_kernel(%arg0: i32, %arg1: i32, %arg2: i32, %arg3: memref<128x256xf32, #tpu.memory_space<vmem>>, %arg4: memref<128x256xf32, #tpu.memory_space<vmem>>, %arg5: memref<128x128xf32, #tpu.memory_space<vmem>>) attributes {dimension_semantics = [#tpu.dimension_semantics<parallel>, #tpu.dimension_semantics<parallel>, #tpu.dimension_semantics<arbitrary>], iteration_bounds = array<i64: 1, 1, 1>, scalar_prefetch = 0 : i64, scratch_operands = 0 : i64, tpu.core_type = #tpu.core_type<tc>, window_params = [{transform_indices = @transform_0, window_bounds = array<i64: 128, 256>}, {transform_indices = @transform_1, window_bounds = array<i64: 128, 256>}, {transform_indices = @transform_2, window_bounds = array<i64: 128, 128>}]} {
    %c0_i32 = arith.constant 0 : i32
    %0 = arith.cmpi eq, %arg2, %c0_i32 : i32
    %1 = arith.extui %0 : i1 to i32
    %c0_i32_0 = arith.constant 0 : i32
    %2 = arith.cmpi ne, %1, %c0_i32_0 : i32
    scf.if %2 {
      %cst_10 = arith.constant 0.000000e+00 : f32
      %12 = vector.broadcast %cst_10 : f32 to vector<128x128xf32>
      %c0_11 = arith.constant 0 : index
      %c0_12 = arith.constant 0 : index
      %13 = vector.load %arg5[%c0_11, %c0_12] : memref<128x128xf32, #tpu.memory_space<vmem>>, vector<128x128xf32>
      tpu.vector_store %arg5[%c0_11, %c0_12], %12 {strides = array<i32>} : memref<128x128xf32, #tpu.memory_space<vmem>>, vector<128x128xf32>,
    } else {
    }
    %c0 = arith.constant 0 : index
    %c0_1 = arith.constant 0 : index
    %3 = vector.load %arg5[%c0, %c0_1] : memref<128x128xf32, #tpu.memory_space<vmem>>, vector<128x128xf32>
    %c0_2 = arith.constant 0 : index
    %c0_3 = arith.constant 0 : index
    %4 = vector.load %arg3[%c0_2, %c0_3] : memref<128x256xf32, #tpu.memory_space<vmem>>, vector<128x256xf32>
    %c0_4 = arith.constant 0 : index
    %c0_5 = arith.constant 0 : index
    %5 = vector.load %arg4[%c0_4, %c0_5] : memref<128x256xf32, #tpu.memory_space<vmem>>, vector<128x256xf32>
    %cst = arith.constant dense<0.000000e+00> : vector<128x128xf32>
    %6 = tpu.matmul %4, %5, %cst {dimension_numbers = #tpu.dot_dimension_numbers<[1], [1], [0], [0], [0, 0, 1, 0], [], []>} : vector<128x256xf32>, vector<128x256xf32>, vector<128x128xf32> -> vector<128x128xf32>
    %7 = arith.addf %3, %6 : vector<128x128xf32>
    %c0_6 = arith.constant 0 : index
    %c0_7 = arith.constant 0 : index
    %8 = vector.load %arg5[%c0_6, %c0_7] : memref<128x128xf32, #tpu.memory_space<vmem>>, vector<128x128xf32>
    tpu.vector_store %arg5[%c0_6, %c0_7], %7 {strides = array<i32>} : memref<128x128xf32, #tpu.memory_space<vmem>>, vector<128x128xf32>,
    %c0_i32_8 = arith.constant 0 : i32
    %9 = arith.cmpi eq, %arg2, %c0_i32_8 : i32
    %10 = arith.extui %9 : i1 to i32
    %c0_i32_9 = arith.constant 0 : i32
    %11 = arith.cmpi ne, %10, %c0_i32_9 : i32
    scf.if %11 {
      %c0_10 = arith.constant 0 : index
      %c0_11 = arith.constant 0 : index
      %12 = vector.load %arg5[%c0_10, %c0_11] : memref<128x128xf32, #tpu.memory_space<vmem>>, vector<128x128xf32>
      %cst_12 = arith.constant 4.8828125E-4 : f32
      %13 = vector.broadcast %cst_12 : f32 to vector<128x128xf32>
      %14 = arith.mulf %12, %13 : vector<128x128xf32>
      %c0_13 = arith.constant 0 : index
      %c0_14 = arith.constant 0 : index
      %15 = vector.load %arg5[%c0_13, %c0_14] : memref<128x128xf32, #tpu.memory_space<vmem>>, vector<128x128xf32>
      tpu.vector_store %arg5[%c0_13, %c0_14], %14 {strides = array<i32>} : memref<128x128xf32, #tpu.memory_space<vmem>>, vector<128x128xf32>,
    } else {
    }
    return
  }
  func.func @transform_0(%arg0: i32, %arg1: i32, %arg2: i32) -> (i32, i32) {
    %c0_i32 = arith.constant 0 : i32
    return %arg0, %arg2 : i32, i32
  }
  func.func @transform_1(%arg0: i32, %arg1: i32, %arg2: i32) -> (i32, i32) {
    %c0_i32 = arith.constant 0 : i32
    return %arg1, %arg2 : i32, i32
  }
  func.func @transform_2(%arg0: i32, %arg1: i32, %arg2: i32) -> (i32, i32) {
    %c0_i32 = arith.constant 0 : i32
    return %arg0, %arg1 : i32, i32
  }
}

</mosaic_0001>

<bundles_post_ra>
// kernel: tpu_custom_call.1
= control target key start
LH: loop header
LB: loop body
LE: loop exit
PB: predicated region body
PF: predicated region fallthrough
CT: control target
= control target key end

     0   :  { %7 = vsyncpa [#allocation3], 0  ;;  %s526_s0 = inlined_call_operand.hbm [shape: f32[128,256], index: 0, kind: input, shape index: {}]   ;;  %s527_s1 = inlined_call_operand.hbm [shape: f32[128,256], index: 1, kind: input, shape index: {}]   ;;  %s528_s2 = inlined_call_operand.hbm [shape: f32[128,128], index: 2, kind: output, shape index: {}]  }
   0x1   :  { %8 = vsyncpa [#allocation6], 0 }
   0x2   :  { %9 = vsyncpa [#allocation4], 0  ;;  %s14_s11 = sshll.u32 %s526_s0, 4  ;;  %s495_s12 = smov [#allocation2]   ;;  %s15_s11 = int_to_ptr.hbm [resolvable:$true] %s14_s11 }
   0x3   :  { %s16_s13 = sshll.u32 %s495_s12, 4  ;;  %s27_s16 = sshll.u32 %s527_s1, 4  ;;  %s17_s13 = int_to_ptr.vmem [resolvable:$true] %s16_s13  ;;  %s28_s16 = int_to_ptr.hbm [resolvable:$true] %s27_s16 }
   0x4   :  { %s496_s17 = smov 256   ;;  %s497_s18 = smov 16  }
   0x5   :  { %22 = dma.hbm_to_vmem [thread:$0]  %s15_s11, 4096, %s17_s13, [#allocation3], %s496_s17, %s496_s17, %s497_s18  }
   0x6   :  { %s498_s19 = smov [#allocation5]  }
   0x7   :  { %s29_s20 = sshll.u32 %s498_s19, 4  ;;  %s30_s20 = int_to_ptr.vmem [resolvable:$true] %s29_s20 }
   0x8   :  { %35 = dma.hbm_to_vmem [thread:$0]  %s28_s16, 4096, %s30_s20, [#allocation6], %s496_s17, %s496_s17, %s497_s18  }
   0x9   :  { %489 = dma.done.wait [#allocation3], 4096  }
   0xa   :  { %490 = vsyncadd [#allocation3], 4294963200 }
   0xb   :  { %491 = dma.done.wait [#allocation6], 4096  }
   0xc   :  { %492 = vsyncadd [#allocation6], 4294963200  ;;  %v142_v0 = vld [vmem:[#allocation5 + $0xf0] sm:$0xff]  ;;  %v143_v1 = vld [vmem:[#allocation5 + $0xf8] sm:$0xff]  ;;  %s499_s0 = smov [#allocation7]   ;;  %s363_s23 = sshll.u32 %s528_s2, 4  ;;  %s364_s23 = int_to_ptr.hbm [resolvable:$true] %s363_s23 }
   0xd   :  { %377 = vmatpush.xpose.msra.mxu2 %v142_v0  ;;  %393 = vmatpush.xpose.msra.mxu3 %v143_v1  ;;  %v140_v2 = vld [vmem:[#allocation5 + $0xe0] sm:$0xff]  ;;  %v141_v3 = vld [vmem:[#allocation5 + $0xe8] sm:$0xff]  ;;  %v138_v4 = vld [vmem:[#allocation5 + $0xd0] sm:$0xff]  ;;  %s361_s1 = sshll.u32 %s499_s0, 4  ;;  %s500_s24 = smov 128   ;;  %s362_s1 = int_to_ptr.vmem [resolvable:$true] %s361_s1 }
   0xe   :  { %144 = vmatpush.xpose.msra.mxu0 %v142_v0  ;;  %209 = vmatpush.xpose.msra.mxu1 %v143_v1  ;;  %v139_v5 = vld [vmem:[#allocation5 + $0xd8] sm:$0xff]  ;;  %v136_v6 = vld [vmem:[#allocation5 + $0xc0] sm:$0xff]  ;;  %v137_v7 = vld [vmem:[#allocation5 + $0xc8] sm:$0xff]  ;;  %s501_s25 = smov 8  }
   0xf   :  { %v134_v8 = vld [vmem:[#allocation5 + $0xb0] sm:$0xff]  ;;  %v135_v9 = vld [vmem:[#allocation5 + $0xb8] sm:$0xff]  ;;  %v132_v10 = vld [vmem:[#allocation5 + $0xa0] sm:$0xff] }
  0x10   :  { %v133_v11 = vld [vmem:[#allocation5 + $0xa8] sm:$0xff]  ;;  %v130_v12 = vld [vmem:[#allocation5 + $0x90] sm:$0xff]  ;;  %v131_v13 = vld [vmem:[#allocation5 + $0x98] sm:$0xff] }
  0x11   :  { %378 = vmatpush.xpose.msra.mxu2 %v140_v2  ;;  %394 = vmatpush.xpose.msra.mxu3 %v141_v3  ;;  %v128_v14 = vld [vmem:[#allocation5 + $0x80] sm:$0xff]  ;;  %v129_v15 = vld [vmem:[#allocation5 + $0x88] sm:$0xff]  ;;  %v126_v16 = vld [vmem:[#allocation5 + $0x70] sm:$0xff] }
  0x12   :  { %145 = vmatpush.xpose.msra.mxu0 %v140_v2  ;;  %210 = vmatpush.xpose.msra.mxu1 %v141_v3  ;;  %v127_v17 = vld [vmem:[#allocation5 + $0x78] sm:$0xff]  ;;  %v124_v18 = vld [vmem:[#allocation5 + $0x60] sm:$0xff]  ;;  %v125_v19 = vld [vmem:[#allocation5 + $0x68] sm:$0xff] }
  0x13   :  { %v122_v20 = vld [vmem:[#allocation5 + $0x50] sm:$0xff]  ;;  %v123_v21 = vld [vmem:[#allocation5 + $0x58] sm:$0xff]  ;;  %v120_v22 = vld [vmem:[#allocation5 + $0x40] sm:$0xff] }
  0x14   :  { %v121_v23 = vld [vmem:[#allocation5 + $0x48] sm:$0xff]  ;;  %v118_v24 = vld [vmem:[#allocation5 + $0x30] sm:$0xff]  ;;  %v119_v25 = vld [vmem:[#allocation5 + $0x38] sm:$0xff] }
  0x15   :  { %379 = vmatpush.xpose.msra.mxu2 %v138_v4  ;;  %395 = vmatpush.xpose.msra.mxu3 %v139_v5  ;;  %v116_v26 = vld [vmem:[#allocation5 + $0x20] sm:$0xff]  ;;  %v117_v27 = vld [vmem:[#allocation5 + $0x28] sm:$0xff]  ;;  %v114_v28 = vld [vmem:[#allocation5 + $0x10] sm:$0xff] }
  0x16   :  { %146 = vmatpush.xpose.msra.mxu0 %v138_v4  ;;  %211 = vmatpush.xpose.msra.mxu1 %v139_v5  ;;  %v115_v29 = vld [vmem:[#allocation5 + $0x18] sm:$0xff]  ;;  %v112_v30 = vld [vmem:[#allocation5] sm:$0xff]  ;;  %v113_v31 = vld [vmem:[#allocation5 + $0x8] sm:$0xff] }
  0x17   :  { %v96_v32 = vld [vmem:[#allocation2 + $0x80] sm:$0xff]  ;;  %v97_v33 = vld [vmem:[#allocation2 + $0x88] sm:$0xff]  ;;  %v98_v36 = vld [vmem:[#allocation2 + $0x90] sm:$0xff] }
  0x18   :  { %v80_v34 = vld [vmem:[#allocation2] sm:$0xff]  ;;  %v81_v35 = vld [vmem:[#allocation2 + $0x8] sm:$0xff]  ;;  %v99_v37 = vld [vmem:[#allocation2 + $0x98] sm:$0xff] }
  0x19   :  { %380 = vmatpush.xpose.msra.mxu2 %v136_v6  ;;  %396 = vmatpush.xpose.msra.mxu3 %v137_v7  ;;  %v82_v38 = vld [vmem:[#allocation2 + $0x10] sm:$0xff]  ;;  %v83_v39 = vld [vmem:[#allocation2 + $0x18] sm:$0xff]  ;;  %v100_v40 = vld [vmem:[#allocation2 + $0xa0] sm:$0xff] }
  0x1a   :  { %147 = vmatpush.xpose.msra.mxu0 %v136_v6  ;;  %212 = vmatpush.xpose.msra.mxu1 %v137_v7  ;;  %v101_v41 = vld [vmem:[#allocation2 + $0xa8] sm:$0xff]  ;;  %v84_v42 = vld [vmem:[#allocation2 + $0x20] sm:$0xff]  ;;  %v102_v44 = vld [vmem:[#allocation2 + $0xb0] sm:$0xff] }
  0x1b   :  { %v85_v43 = vld [vmem:[#allocation2 + $0x28] sm:$0xff]  ;;  %v103_v45 = vld [vmem:[#allocation2 + $0xb8] sm:$0xff]  ;;  %v86_v46 = vld [vmem:[#allocation2 + $0x30] sm:$0xff] }
  0x1c   :  { %v87_v47 = vld [vmem:[#allocation2 + $0x38] sm:$0xff]  ;;  %v104_v48 = vld [vmem:[#allocation2 + $0xc0] sm:$0xff]  ;;  %v105_v49 = vld [vmem:[#allocation2 + $0xc8] sm:$0xff] }
  0x1d   :  { %381 = vmatpush.xpose.msra.mxu2 %v134_v8  ;;  %397 = vmatpush.xpose.msra.mxu3 %v135_v9  ;;  %v88_v50 = vld [vmem:[#allocation2 + $0x40] sm:$0xff]  ;;  %v89_v51 = vld [vmem:[#allocation2 + $0x48] sm:$0xff]  ;;  %v106_v52 = vld [vmem:[#allocation2 + $0xd0] sm:$0xff] }
  0x1e   :  { %148 = vmatpush.xpose.msra.mxu0 %v134_v8  ;;  %213 = vmatpush.xpose.msra.mxu1 %v135_v9  ;;  %v107_v53 = vld [vmem:[#allocation2 + $0xd8] sm:$0xff]  ;;  %v90_v54 = vld [vmem:[#allocation2 + $0x50] sm:$0xff]  ;;  %v108_v56 = vld [vmem:[#allocation2 + $0xe0] sm:$0xff] }
  0x1f   :  { %v91_v55 = vld [vmem:[#allocation2 + $0x58] sm:$0xff]  ;;  %v109_v57 = vld [vmem:[#allocation2 + $0xe8] sm:$0xff]  ;;  %v92_v58 = vld [vmem:[#allocation2 + $0x60] sm:$0xff] }
  0x20   :  { %v93_v59 = vld [vmem:[#allocation2 + $0x68] sm:$0xff]  ;;  %v110_v60 = vld [vmem:[#allocation2 + $0xf0] sm:$0xff]  ;;  %v111_v61 = vld [vmem:[#allocation2 + $0xf8] sm:$0xff] }
  0x21   :  { %382 = vmatpush.xpose.msra.mxu2 %v132_v10  ;;  %398 = vmatpush.xpose.msra.mxu3 %v133_v11  ;;  %v94_v62 = vld [vmem:[#allocation2 + $0x70] sm:$0xff]  ;;  %v95_v63 = vld [vmem:[#allocation2 + $0x78] sm:$0xff] }
  0x22   :  { %149 = vmatpush.xpose.msra.mxu0 %v132_v10  ;;  %214 = vmatpush.xpose.msra.mxu1 %v133_v11 }
  0x25   :  { %383 = vmatpush.xpose.msra.mxu2 %v130_v12  ;;  %399 = vmatpush.xpose.msra.mxu3 %v131_v13 }
  0x26   :  { %150 = vmatpush.xpose.msra.mxu0 %v130_v12  ;;  %215 = vmatpush.xpose.msra.mxu1 %v131_v13 }
  0x29   :  { %384 = vmatpush.xpose.msra.mxu2 %v128_v14  ;;  %400 = vmatpush.xpose.msra.mxu3 %v129_v15 }
  0x2a   :  { %151 = vmatpush.xpose.msra.mxu0 %v128_v14  ;;  %216 = vmatpush.xpose.msra.mxu1 %v129_v15 }
  0x2d   :  { %385 = vmatpush.xpose.msra.mxu2 %v126_v16  ;;  %401 = vmatpush.xpose.msra.mxu3 %v127_v17 }
  0x2e   :  { %152 = vmatpush.xpose.msra.mxu0 %v126_v16  ;;  %217 = vmatpush.xpose.msra.mxu1 %v127_v17 }
  0x31   :  { %386 = vmatpush.xpose.msra.mxu2 %v124_v18  ;;  %402 = vmatpush.xpose.msra.mxu3 %v125_v19 }
  0x32   :  { %153 = vmatpush.xpose.msra.mxu0 %v124_v18  ;;  %218 = vmatpush.xpose.msra.mxu1 %v125_v19 }
  0x35   :  { %387 = vmatpush.xpose.msra.mxu2 %v122_v20  ;;  %403 = vmatpush.xpose.msra.mxu3 %v123_v21 }
  0x36   :  { %154 = vmatpush.xpose.msra.mxu0 %v122_v20  ;;  %219 = vmatpush.xpose.msra.mxu1 %v123_v21 }
  0x39   :  { %388 = vmatpush.xpose.msra.mxu2 %v120_v22  ;;  %404 = vmatpush.xpose.msra.mxu3 %v121_v23 }
  0x3a   :  { %155 = vmatpush.xpose.msra.mxu0 %v120_v22  ;;  %220 = vmatpush.xpose.msra.mxu1 %v121_v23 }
  0x3d   :  { %389 = vmatpush.xpose.msra.mxu2 %v118_v24  ;;  %405 = vmatpush.xpose.msra.mxu3 %v119_v25 }
  0x3e   :  { %156 = vmatpush.xpose.msra.mxu0 %v118_v24  ;;  %221 = vmatpush.xpose.msra.mxu1 %v119_v25 }
  0x41   :  { %390 = vmatpush.xpose.msra.mxu2 %v116_v26  ;;  %406 = vmatpush.xpose.msra.mxu3 %v117_v27 }
  0x42   :  { %157 = vmatpush.xpose.msra.mxu0 %v116_v26  ;;  %222 = vmatpush.xpose.msra.mxu1 %v117_v27 }
  0x45   :  { %391 = vmatpush.xpose.msra.mxu2 %v114_v28  ;;  %407 = vmatpush.xpose.msra.mxu3 %v115_v29 }
  0x46   :  { %158 = vmatpush.xpose.msra.mxu0 %v114_v28  ;;  %223 = vmatpush.xpose.msra.mxu1 %v115_v29 }
  0x49   :  { %392 = vmatpush.xpose.msra.mxu2 %v112_v30  ;;  %408 = vmatpush.xpose.msra.mxu3 %v113_v31 }
  0x4a   :  { %159 = vmatpush.xpose.msra.mxu0 %v112_v30  ;;  %224 = vmatpush.xpose.msra.mxu1 %v113_v31 }
  0x4c   :  { %184 = vmatmul.f32.vlgmr.msra.gmra.mxu2 %v96_v32  ;;  %249 = vmatmul.f32.vlgmr.msra.gmra.mxu3 %v97_v33 }
  0x4d   :  { %160 = vmatmul.f32.vlgmr.msra.gmra.mxu0 %v80_v34  ;;  %225 = vmatmul.f32.vlgmr.msra.gmra.mxu1 %v81_v35 }
  0x54   :  { %187 = vmatmul.f32.gmra.mxu2 %v98_v36  ;;  %252 = vmatmul.f32.gmra.mxu3 %v99_v37 }
  0x55   :  { %163 = vmatmul.f32.gmra.mxu0 %v82_v38  ;;  %228 = vmatmul.f32.gmra.mxu1 %v83_v39 }
  0x5c   :  { %190 = vmatmul.f32.gmra.mxu2 %v100_v40  ;;  %255 = vmatmul.f32.gmra.mxu3 %v101_v41 }
  0x5d   :  { %166 = vmatmul.f32.gmra.mxu0 %v84_v42  ;;  %231 = vmatmul.f32.gmra.mxu1 %v85_v43 }
  0x64   :  { %193 = vmatmul.f32.gmra.mxu2 %v102_v44  ;;  %258 = vmatmul.f32.gmra.mxu3 %v103_v45 }
  0x65   :  { %169 = vmatmul.f32.gmra.mxu0 %v86_v46  ;;  %234 = vmatmul.f32.gmra.mxu1 %v87_v47 }
  0x6c   :  { %196 = vmatmul.f32.gmra.mxu2 %v104_v48  ;;  %261 = vmatmul.f32.gmra.mxu3 %v105_v49 }
  0x6d   :  { %172 = vmatmul.f32.gmra.mxu0 %v88_v50  ;;  %237 = vmatmul.f32.gmra.mxu1 %v89_v51 }
  0x74   :  { %199 = vmatmul.f32.gmra.mxu2 %v106_v52  ;;  %264 = vmatmul.f32.gmra.mxu3 %v107_v53 }
  0x75   :  { %175 = vmatmul.f32.gmra.mxu0 %v90_v54  ;;  %240 = vmatmul.f32.gmra.mxu1 %v91_v55 }
  0x7c   :  { %202 = vmatmul.f32.gmra.mxu2 %v108_v56  ;;  %267 = vmatmul.f32.gmra.mxu3 %v109_v57 }
  0x7d   :  { %178 = vmatmul.f32.gmra.mxu0 %v92_v58  ;;  %243 = vmatmul.f32.gmra.mxu1 %v93_v59 }
  0x84   :  { %205 = vmatmul.f32.gmra.mxu2 %v110_v60  ;;  %270 = vmatmul.f32.gmra.mxu3 %v111_v61 }
  0x85   :  { %181 = vmatmul.f32.gmra.mxu0 %v94_v62  ;;  %246 = vmatmul.f32.gmra.mxu1 %v95_v63 }
  0xca   :  { %v161_v0 = vpop.f32.mrf.mxu0  ;;  %v226_v1 = vpop.f32.mrf.mxu1 }
  0xcb   :  { %v227_v2 = vadd.f32 %v226_v1, %v161_v0 }
  0xcd   :  { %v325_v4 = vmul.f32 0.00048828125, %v227_v2 }
  0xcf   :  { %v185_v3 = vpop.f32.mrf.mxu2  ;;  %v250_v5 = vpop.f32.mrf.mxu3  ;;  %341 = vst [vmem:[#allocation7] sm:$0xff] %v325_v4 }
  0xd0   :  { %v251_v6 = vadd.f32 %v250_v5, %v185_v3 }
  0xd2   :  { %v164_v7 = vpop.f32.mrf.mxu0  ;;  %v229_v8 = vpop.f32.mrf.mxu1  ;;  %v333_v10 = vmul.f32 0.00048828125, %v251_v6 }
  0xd3   :  { %v230_v9 = vadd.f32 %v229_v8, %v164_v7 }
  0xd4   :  { %349 = vst [vmem:[#allocation7 + $0x40] sm:$0xff] %v333_v10 }
  0xd5   :  { %v326_v12 = vmul.f32 0.00048828125, %v230_v9 }
  0xd7   :  { %v188_v11 = vpop.f32.mrf.mxu2  ;;  %v253_v13 = vpop.f32.mrf.mxu3  ;;  %342 = vst [vmem:[#allocation7 + $0x8] sm:$0xff] %v326_v12 }
  0xd8   :  { %v254_v14 = vadd.f32 %v253_v13, %v188_v11 }
  0xda   :  { %v167_v15 = vpop.f32.mrf.mxu0  ;;  %v232_v16 = vpop.f32.mrf.mxu1  ;;  %v334_v18 = vmul.f32 0.00048828125, %v254_v14 }
  0xdb   :  { %v233_v17 = vadd.f32 %v232_v16, %v167_v15 }
  0xdc   :  { %350 = vst [vmem:[#allocation7 + $0x48] sm:$0xff] %v334_v18 }
  0xdd   :  { %v327_v20 = vmul.f32 0.00048828125, %v233_v17 }
  0xdf   :  { %v191_v19 = vpop.f32.mrf.mxu2  ;;  %v256_v21 = vpop.f32.mrf.mxu3  ;;  %343 = vst [vmem:[#allocation7 + $0x10] sm:$0xff] %v327_v20 }
  0xe0   :  { %v257_v22 = vadd.f32 %v256_v21, %v191_v19 }
  0xe2   :  { %v170_v23 = vpop.f32.mrf.mxu0  ;;  %v235_v24 = vpop.f32.mrf.mxu1  ;;  %v335_v26 = vmul.f32 0.00048828125, %v257_v22 }
  0xe3   :  { %v236_v25 = vadd.f32 %v235_v24, %v170_v23 }
  0xe4   :  { %351 = vst [vmem:[#allocation7 + $0x50] sm:$0xff] %v335_v26 }
  0xe5   :  { %v328_v28 = vmul.f32 0.00048828125, %v236_v25 }
  0xe7   :  { %v194_v27 = vpop.f32.mrf.mxu2  ;;  %v259_v29 = vpop.f32.mrf.mxu3  ;;  %344 = vst [vmem:[#allocation7 + $0x18] sm:$0xff] %v328_v28 }
  0xe8   :  { %v260_v30 = vadd.f32 %v259_v29, %v194_v27 }
  0xea   :  { %v173_v31 = vpop.f32.mrf.mxu0  ;;  %v238_v32 = vpop.f32.mrf.mxu1  ;;  %v336_v34 = vmul.f32 0.00048828125, %v260_v30 }
  0xeb   :  { %v239_v33 = vadd.f32 %v238_v32, %v173_v31 }
  0xec   :  { %352 = vst [vmem:[#allocation7 + $0x58] sm:$0xff] %v336_v34 }
  0xed   :  { %v329_v36 = vmul.f32 0.00048828125, %v239_v33 }
  0xef   :  { %v197_v35 = vpop.f32.mrf.mxu2  ;;  %v262_v37 = vpop.f32.mrf.mxu3  ;;  %345 = vst [vmem:[#allocation7 + $0x20] sm:$0xff] %v329_v36 }
  0xf0   :  { %v263_v38 = vadd.f32 %v262_v37, %v197_v35 }
  0xf2   :  { %v176_v39 = vpop.f32.mrf.mxu0  ;;  %v241_v40 = vpop.f32.mrf.mxu1  ;;  %v337_v42 = vmul.f32 0.00048828125, %v263_v38 }
  0xf3   :  { %v242_v41 = vadd.f32 %v241_v40, %v176_v39 }
  0xf4   :  { %353 = vst [vmem:[#allocation7 + $0x60] sm:$0xff] %v337_v42 }
  0xf5   :  { %v330_v44 = vmul.f32 0.00048828125, %v242_v41 }
  0xf7   :  { %v200_v43 = vpop.f32.mrf.mxu2  ;;  %v265_v45 = vpop.f32.mrf.mxu3  ;;  %346 = vst [vmem:[#allocation7 + $0x28] sm:$0xff] %v330_v44 }
  0xf8   :  { %v266_v46 = vadd.f32 %v265_v45, %v200_v43 }
  0xfa   :  { %v179_v47 = vpop.f32.mrf.mxu0  ;;  %v244_v48 = vpop.f32.mrf.mxu1  ;;  %v338_v50 = vmul.f32 0.00048828125, %v266_v46 }
  0xfb   :  { %v245_v49 = vadd.f32 %v244_v48, %v179_v47 }
  0xfc   :  { %354 = vst [vmem:[#allocation7 + $0x68] sm:$0xff] %v338_v50 }
  0xfd   :  { %v331_v52 = vmul.f32 0.00048828125, %v245_v49 }
  0xff   :  { %v203_v51 = vpop.f32.mrf.mxu2  ;;  %v268_v53 = vpop.f32.mrf.mxu3  ;;  %347 = vst [vmem:[#allocation7 + $0x30] sm:$0xff] %v331_v52 }
 0x100   :  { %v269_v54 = vadd.f32 %v268_v53, %v203_v51 }
 0x102   :  { %v182_v55 = vpop.f32.mrf.mxu0  ;;  %v247_v56 = vpop.f32.mrf.mxu1  ;;  %v339_v58 = vmul.f32 0.00048828125, %v269_v54 }
 0x103   :  { %v248_v57 = vadd.f32 %v247_v56, %v182_v55 }
 0x104   :  { %355 = vst [vmem:[#allocation7 + $0x70] sm:$0xff] %v339_v58 }
 0x105   :  { %v332_v60 = vmul.f32 0.00048828125, %v248_v57 }
 0x107   :  { %v206_v59 = vpop.f32.mrf.mxu2  ;;  %v271_v61 = vpop.f32.mrf.mxu3  ;;  %348 = vst [vmem:[#allocation7 + $0x38] sm:$0xff] %v332_v60 }
 0x108   :  { %v272_v62 = vadd.f32 %v271_v61, %v206_v59 }
 0x10a   :  { %v340_v63 = vmul.f32 0.00048828125, %v272_v62 }
 0x10c   :  { %356 = vst [vmem:[#allocation7 + $0x78] sm:$0xff] %v340_v63 }
 0x10d   :  { %369 = dma.vmem_to_hbm [thread:$0]  %s362_s1, 2048, %s364_s23, [#allocation4], %s500_s24, %s500_s24, %s501_s25  }
 0x10e   :  { %493 = dma.done.wait [#allocation4], 2048  }
 0x10f   :  { %494 = vsyncadd [#allocation4], 4294965248 }
 0x110   :  { %374 = vsyncpa [#allocation3], 1 }
 0x111   :  { %375 = vsyncpa [#allocation6], 1 }
 0x112   :  { %376 = vsyncpa [#allocation4], 1 }

</bundles_post_ra>
